<compile_context>
chip_gen: v5e
topology: v5e:2x2
jax: 0.10.0
libtpu: 0.0.40
codegen_flags: <defaults>
</compile_context>

<pallas_src>
import functools

import jax
import jax.numpy as jnp
from jax.experimental import pallas as pl
from jax.experimental.pallas import tpu as pltpu


def _round_up(x, m):
    return -(-x // m) * m


def _pad_to(a, shape):
    pads = [(0, s - d) for d, s in zip(a.shape, shape)]
    if any(p[1] for p in pads):
        return jnp.pad(a, pads)
    return a


def _pick_tiles(N, GS):
    """Choose (N_pad, row-tile TM). TM divides N_pad; both multiples of 16."""
    if N <= 256:
        n_pad = _round_up(N, 16)
        return n_pad, n_pad
    tm = 256
    # shrink the row tile until the double-buffered bf16 G block is modest
    while tm > 16 and 2 * GS * tm * _round_up(N, tm) * 2 > 24 * 2**20:
        tm //= 2
    return _round_up(N, tm), tm


def _vmem_limit_bytes(GS, N_pad, C_pad, P_pad, TM, n_outputs):
    g_blk = GS * TM * N_pad * 2                 # bf16
    x_blk = N_pad * C_pad * 4
    w_blk = C_pad * GS * P_pad * 4
    b_blk = GS * P_pad * 4
    o_blk = n_outputs * TM * P_pad * 4
    scratch = N_pad * GS * P_pad * 4
    need = 2 * (g_blk + x_blk + w_blk + b_blk + o_blk) + scratch   # x2 double-buffering
    # 64 MiB ceiling keeps us safe on v7x (64 MiB physical VMEM per TC).
    return int(min(max(int(need * 1.4), 32 * 2**20), 64 * 2**20))


def _layer_kernel(g_ref, x_ref, w_ref, b_ref, *outs_scratch,
                  GS, P_pad, TM, residual, agg):
    # g_ref : (1, GS, TM, N_pad)  bf16     x_ref : (1, N_pad, C_pad) f32
    # w_ref : (C_pad, GS*P_pad)   f32      b_ref : (1, GS*P_pad)     f32
    # residual: outs = (xnext_ref, hw_ref) each (1, TM, P_pad); else outs = (hw_ref,)
    # h_ref : (N_pad, GS*P_pad) VMEM scratch (persists across row tiles)
    if residual:
        xnext_ref, hw_ref, h_ref = outs_scratch
    else:
        hw_ref, h_ref = outs_scratch
        xnext_ref = None
    r = pl.program_id(1)

    # h = x @ W_stacked + bias: computed once per batch element (row tile 0) and
    # reused across row tiles (row axis is 'arbitrary' -> sequential per batch elem).
    @pl.when(r == 0)
    def _():
        h_ref[...] = (jnp.dot(x_ref[0], w_ref[...],
                              preferred_element_type=jnp.float32) + b_ref[...])

    acc = None
    for g in range(GS):                              # GS is small -> static unroll
        gg = g_ref[0, g].astype(jnp.float32)         # bf16 0/1 adjacency -> exact f32
        y = jnp.dot(gg, h_ref[:, g * P_pad:(g + 1) * P_pad],
                    preferred_element_type=jnp.float32)
        y = jnp.maximum(y, 0.0)                      # ReLU before GS aggregation
        if acc is None:
            acc = y
        elif agg == 'sum':
            acc = acc + y
        else:                                        # 'max'
            acc = jnp.maximum(acc, y)

    hw_ref[0] = acc.astype(hw_ref.dtype)             # highway output x2 (pre-residual)

    if residual:                                     # static: only when C == P (unpadded)
        row0 = pl.multiple_of(r * TM, TM)
        xnext_ref[0] = (acc + x_ref[0, pl.ds(row0, TM), :]).astype(xnext_ref.dtype)


@functools.lru_cache(maxsize=None)
def _make_layer_call(B, GS, N_pad, C_pad, P_pad, TM, residual, agg):
    kernel = functools.partial(_layer_kernel, GS=GS, P_pad=P_pad, TM=TM,
                               residual=residual, agg=agg)
    R = N_pad // TM
    hw_shape = jax.ShapeDtypeStruct((B, N_pad, P_pad), jnp.float32)
    hw_spec = pl.BlockSpec((1, TM, P_pad), lambda b, r: (b, r, 0))
    if residual:
        out_shape = (hw_shape, hw_shape)             # (x_next, highway x2)
        out_specs = (hw_spec, hw_spec)
        n_out = 2
    else:
        out_shape = hw_shape                         # x_next == x2 -> single output
        out_specs = hw_spec
        n_out = 1
    return pl.pallas_call(
        kernel,
        out_shape=out_shape,
        grid=(B, R),
        in_specs=[
            pl.BlockSpec((1, GS, TM, N_pad), lambda b, r: (b, 0, r, 0)),   # G (bf16)
            pl.BlockSpec((1, N_pad, C_pad), lambda b, r: (b, 0, 0)),       # x
            pl.BlockSpec((C_pad, GS * P_pad), lambda b, r: (0, 0)),        # W stacked
            pl.BlockSpec((1, GS * P_pad), lambda b, r: (0, 0)),            # bias stacked
        ],
        out_specs=out_specs,
        scratch_shapes=[pltpu.VMEM((N_pad, GS * P_pad), jnp.float32)],
        compiler_params=pltpu.CompilerParams(
            dimension_semantics=("parallel", "arbitrary"),
            vmem_limit_bytes=_vmem_limit_bytes(GS, N_pad, C_pad, P_pad, TM, n_out)),
    )


def init_params(key, input_feature_n, output_features_n, GS, noise=0.05):
    """Per layer (C -> P): GS linear weights (GS, C, P) and biases (GS, P)."""
    fdims = [input_feature_n] + list(output_features_n)
    params = []
    for li in range(len(fdims) - 1):
        C, P = fdims[li], fdims[li + 1]
        key, wk, bk = jax.random.split(key, 3)
        W = jax.random.normal(wk, (GS, C, P), dtype=jnp.float32) * noise
        b = jax.random.normal(bk, (GS, P), dtype=jnp.float32) * noise
        params.append((W, b))
    return params


def graph_mat_highway_layers(G, x, params, resnet=True, agg='sum'):
    """Pallas forward. G:(B,GS,N,N), x:(B,N,C0). Returns (x, highway_stack)."""
    assert agg in ('sum', 'max')
    B, GS, N, _ = G.shape
    C0 = x.shape[-1]
    N_pad, TM = _pick_tiles(N, GS)

    # Pad once; G cast to bf16 (0/1 adjacency exact -> halved DMA traffic).
    Gp = _pad_to(G, (B, GS, N_pad, N_pad)).astype(jnp.bfloat16)
    x_p = _pad_to(x.astype(jnp.float32), (B, N_pad, _round_up(C0, 128)))

    highway = []
    last_P = C0
    for (W, b) in params:
        GS_w, C, P = W.shape
        assert GS_w == GS
        C_pad = _round_up(C, 128)
        P_pad = _round_up(P, 128)
        residual = bool(resnet and (C == P))         # decided on UNPADDED dims
        # Stack the GS linear layers into one wide weight/bias.
        Wp = jnp.zeros((C_pad, GS * P_pad), jnp.float32)
        bp = jnp.zeros((1, GS * P_pad), jnp.float32)
        for g in range(GS):
            Wp = Wp.at[:C, g * P_pad: g * P_pad + P].set(W[g])
            bp = bp.at[0, g * P_pad: g * P_pad + P].set(b[g])

        call = _make_layer_call(B, GS, N_pad, C_pad, P_pad, TM, residual, agg)
        if residual:
            x_p, x2_p = call(Gp, x_p, Wp, bp)        # fused residual add in-kernel
        else:
            x2_p = call(Gp, x_p, Wp, bp)             # x_next == x2, single output
            x_p = x2_p
        highway.append(x2_p[:, :N, :P])
        last_P = P

    x_out = x_p[:, :N, :last_P]
    return x_out, jnp.stack(highway, axis=-1)


def _reference(G, x, params, resnet=True, agg='sum'):
    """Pure-JAX reference mirroring the PyTorch module semantics."""
    highway = []
    for (W, b) in params:
        multi = jnp.einsum('bnc,gcp->bgnp', x, W) + b[None, :, None, :]
        xout = jnp.einsum('bgkl,bglp->bgkp', G, multi)   # torch: G[b,g] @ lin_g(x[b])
        xout = jnp.maximum(xout, 0.0)                    # ReLU before aggregation
        x2 = xout.sum(axis=1) if agg == 'sum' else xout.max(axis=1)
        x3 = x2 + x if (resnet and x.shape == x2.shape) else x2
        highway.append(x2)
        x = x3
    return x, jnp.stack(highway, axis=-1)


if __name__ == "__main__":
    key = jax.random.PRNGKey(0)

    B, N, GS = 2, 16, 2
    input_feature_n = 16
    output_features_n = (32, 32)   # layer 0: 16->32 (no residual), layer 1: 32->32 (residual)

    kG, kx, kp = jax.random.split(key, 3)
    G = (jax.random.uniform(kG, (B, GS, N, N)) > 0.5).astype(jnp.float32)
    x = jax.random.normal(kx, (B, N, input_feature_n), dtype=jnp.float32)
    params = init_params(kp, input_feature_n, output_features_n, GS, noise=0.05)

    out, hw = graph_mat_highway_layers(G, x, params, resnet=True, agg='sum')
    out = jax.block_until_ready(out)
    hw = jax.block_until_ready(hw)

    ref_out, ref_hw = _reference(G, x, params, resnet=True, agg='sum')
    assert out.shape == (B, N, output_features_n[-1])
    assert hw.shape == (B, N, output_features_n[-1], len(output_features_n))
    err = max(float(jnp.max(jnp.abs(out - ref_out))),
              float(jnp.max(jnp.abs(hw - ref_hw))))
    assert err < 1e-4, err

    print("KERNEL_OK")
</pallas_src>

<mosaic_0001>
module attributes {stable_mosaic.version = 11 : i64} {
  func.func @_layer_kernel(%arg0: i32, %arg1: i32, %arg2: memref<1x2x16x16xbf16, #tpu.memory_space<vmem>>, %arg3: memref<1x16x128xf32, #tpu.memory_space<vmem>>, %arg4: memref<128x256xf32, #tpu.memory_space<vmem>>, %arg5: memref<1x256xf32, #tpu.memory_space<vmem>>, %arg6: memref<1x16x128xf32, #tpu.memory_space<vmem>>, %arg7: memref<16x256xf32, #tpu.memory_space<vmem>>) attributes {dimension_semantics = [#tpu.dimension_semantics<parallel>, #tpu.dimension_semantics<arbitrary>], iteration_bounds = array<i64: 2, 1>, scalar_prefetch = 0 : i64, scratch_operands = 1 : i64, tpu.core_type = #tpu.core_type<tc>, window_params = [{transform_indices = @transform_0, window_bounds = array<i64: 1, 2, 16, 16>}, {transform_indices = @transform_1, window_bounds = array<i64: 1, 16, 128>}, {pipeline_mode = #tpu.pipeline_mode<synchronous>, transform_indices = @transform_2, window_bounds = array<i64: 128, 256>}, {pipeline_mode = #tpu.pipeline_mode<synchronous>, transform_indices = @transform_3, window_bounds = array<i64: 1, 256>}, {transform_indices = @transform_4, window_bounds = array<i64: 1, 16, 128>}]} {
    %c0_i32 = arith.constant 0 : i32
    %0 = arith.cmpi eq, %arg1, %c0_i32 : i32
    %1 = arith.extui %0 : i1 to i32
    %c0_i32_0 = arith.constant 0 : i32
    %2 = arith.cmpi ne, %1, %c0_i32_0 : i32
    scf.if %2 {
      %c0_16 = arith.constant 0 : index
      %c0_17 = arith.constant 0 : index
      %c0_18 = arith.constant 0 : index
      %21 = vector.load %arg3[%c0_16, %c0_17, %c0_18] : memref<1x16x128xf32, #tpu.memory_space<vmem>>, vector<1x16x128xf32>
      %22 = vector.shape_cast %21 : vector<1x16x128xf32> to vector<16x128xf32>
      %c0_19 = arith.constant 0 : index
      %c0_20 = arith.constant 0 : index
      %23 = vector.load %arg4[%c0_19, %c0_20] : memref<128x256xf32, #tpu.memory_space<vmem>>, vector<128x256xf32>
      %cst_21 = arith.constant dense<0.000000e+00> : vector<16x256xf32>
      %24 = tpu.matmul %22, %23, %cst_21 {dimension_numbers = #tpu.dot_dimension_numbers<[1], [0], [0], [1], [0, 0, 1, 1], [], []>} : vector<16x128xf32>, vector<128x256xf32>, vector<16x256xf32> -> vector<16x256xf32>
      %c0_22 = arith.constant 0 : index
      %c0_23 = arith.constant 0 : index
      %25 = vector.load %arg5[%c0_22, %c0_23] : memref<1x256xf32, #tpu.memory_space<vmem>>, vector<1x256xf32>
      %26 = vector.broadcast %25 : vector<1x256xf32> to vector<16x256xf32>
      %27 = arith.addf %24, %26 : vector<16x256xf32>
      %c0_24 = arith.constant 0 : index
      %c0_25 = arith.constant 0 : index
      %28 = vector.load %arg7[%c0_24, %c0_25] : memref<16x256xf32, #tpu.memory_space<vmem>>, vector<16x256xf32>
      tpu.vector_store %arg7[%c0_24, %c0_25], %27 {strides = array<i32>} : memref<16x256xf32, #tpu.memory_space<vmem>>, vector<16x256xf32>,
    } else {
    }
    %c0 = arith.constant 0 : index
    %c0_1 = arith.constant 0 : index
    %c0_2 = arith.constant 0 : index
    %c0_3 = arith.constant 0 : index
    %3 = vector.load %arg2[%c0, %c0_1, %c0_2, %c0_3] : memref<1x2x16x16xbf16, #tpu.memory_space<vmem>>, vector<1x1x16x16xbf16>
    %4 = vector.shape_cast %3 : vector<1x1x16x16xbf16> to vector<16x16xbf16>
    %5 = arith.extf %4 : vector<16x16xbf16> to vector<16x16xf32>
    %c0_4 = arith.constant 0 : index
    %c0_5 = arith.constant 0 : index
    %6 = vector.load %arg7[%c0_4, %c0_5] : memref<16x256xf32, #tpu.memory_space<vmem>>, vector<16x128xf32>
    %cst = arith.constant dense<0.000000e+00> : vector<16x128xf32>
    %7 = tpu.matmul %5, %6, %cst {dimension_numbers = #tpu.dot_dimension_numbers<[1], [0], [0], [1], [0, 0, 1, 1], [], []>} : vector<16x16xf32>, vector<16x128xf32>, vector<16x128xf32> -> vector<16x128xf32>
    %cst_6 = arith.constant 0.000000e+00 : f32
    %8 = vector.broadcast %cst_6 : f32 to vector<16x128xf32>
    %9 = arith.maximumf %7, %8 : vector<16x128xf32>
    %c0_7 = arith.constant 0 : index
    %c1 = arith.constant 1 : index
    %c0_8 = arith.constant 0 : index
    %c0_9 = arith.constant 0 : index
    %10 = vector.load %arg2[%c0_7, %c1, %c0_8, %c0_9] : memref<1x2x16x16xbf16, #tpu.memory_space<vmem>>, vector<1x1x16x16xbf16>
    %11 = vector.shape_cast %10 : vector<1x1x16x16xbf16> to vector<16x16xbf16>
    %12 = arith.extf %11 : vector<16x16xbf16> to vector<16x16xf32>
    %c0_10 = arith.constant 0 : index
    %c128 = arith.constant 128 : index
    %13 = vector.load %arg7[%c0_10, %c128] : memref<16x256xf32, #tpu.memory_space<vmem>>, vector<16x128xf32>
    %cst_11 = arith.constant dense<0.000000e+00> : vector<16x128xf32>
    %14 = tpu.matmul %12, %13, %cst_11 {dimension_numbers = #tpu.dot_dimension_numbers<[1], [0], [0], [1], [0, 0, 1, 1], [], []>} : vector<16x16xf32>, vector<16x128xf32>, vector<16x128xf32> -> vector<16x128xf32>
    %cst_12 = arith.constant 0.000000e+00 : f32
    %15 = vector.broadcast %cst_12 : f32 to vector<16x128xf32>
    %16 = arith.maximumf %14, %15 : vector<16x128xf32>
    %17 = arith.addf %9, %16 : vector<16x128xf32>
    %c0_13 = arith.constant 0 : index
    %c0_14 = arith.constant 0 : index
    %c0_15 = arith.constant 0 : index
    %18 = vector.load %arg6[%c0_13, %c0_14, %c0_15] : memref<1x16x128xf32, #tpu.memory_space<vmem>>, vector<1x16x128xf32>
    %19 = vector.shape_cast %18 : vector<1x16x128xf32> to vector<16x128xf32>
    %20 = vector.shape_cast %17 : vector<16x128xf32> to vector<1x16x128xf32>
    tpu.vector_store %arg6[%c0_13, %c0_14, %c0_15], %20 {strides = array<i32>} : memref<1x16x128xf32, #tpu.memory_space<vmem>>, vector<1x16x128xf32>,
    return
  }
  func.func @transform_0(%arg0: i32, %arg1: i32) -> (i32, i32, i32, i32) {
    %c0_i32 = arith.constant 0 : i32
    %c0_i32_0 = arith.constant 0 : i32
    %c0_i32_1 = arith.constant 0 : i32
    return %arg0, %c0_i32, %arg1, %c0_i32_0 : i32, i32, i32, i32
  }
  func.func @transform_1(%arg0: i32, %arg1: i32) -> (i32, i32, i32) {
    %c0_i32 = arith.constant 0 : i32
    %c0_i32_0 = arith.constant 0 : i32
    %c0_i32_1 = arith.constant 0 : i32
    return %arg0, %c0_i32, %c0_i32_0 : i32, i32, i32
  }
  func.func @transform_2(%arg0: i32, %arg1: i32) -> (i32, i32) {
    %c0_i32 = arith.constant 0 : i32
    %c0_i32_0 = arith.constant 0 : i32
    %c0_i32_1 = arith.constant 0 : i32
    return %c0_i32, %c0_i32_0 : i32, i32
  }
  func.func @transform_3(%arg0: i32, %arg1: i32) -> (i32, i32) {
    %c0_i32 = arith.constant 0 : i32
    %c0_i32_0 = arith.constant 0 : i32
    %c0_i32_1 = arith.constant 0 : i32
    return %c0_i32, %c0_i32_0 : i32, i32
  }
  func.func @transform_4(%arg0: i32, %arg1: i32) -> (i32, i32, i32) {
    %c0_i32 = arith.constant 0 : i32
    %c0_i32_0 = arith.constant 0 : i32
    return %arg0, %arg1, %c0_i32 : i32, i32, i32
  }
}

</mosaic_0001>

<bundles_post_ra>
// kernel: tpu_custom_call.1
= control target key start
LH: loop header
LB: loop body
LE: loop exit
PB: predicated region body
PF: predicated region fallthrough
CT: control target
= control target key end

     0   :  { %s1126_s0 = inlined_call_operand.hbm [shape: bf16[2,2,16,16], index: 0, kind: input, shape index: {}]   ;;  %s1127_s1 = inlined_call_operand.hbm [shape: f32[2,16,128], index: 1, kind: input, shape index: {}]   ;;  %s1128_s2 = inlined_call_operand.hbm [shape: f32[128,256], index: 2, kind: input, shape index: {}]   ;;  %s1129_s3 = inlined_call_operand.vmem [shape: f32[1,256], index: 3, kind: input, shape index: {}]   ;;  %s1130_s4 = inlined_call_operand.hbm [shape: f32[2,16,128], index: 4, kind: output, shape index: {}]  }
   0x1   :  { %1134 = sst [smem:[#allocation18_spill]] %s1126_s0 }
   0x2   :  { %1135 = sst [smem:[#allocation19_spill]] %s1128_s2 }
   0x3   :  { %9 = vsyncpa [#allocation4], 0 }
   0x4   :  { %11 = vsyncpa [#allocation4 + $0x1], 0 }
   0x5   :  { %12 = vsyncpa [#allocation7], 0 }
   0x6   :  { %14 = vsyncpa [#allocation7 + $0x1], 0 }
   0x7   :  { %15 = vsyncpa [#allocation5], 0 }
   0x8   :  { %17 = vsyncpa [#allocation5 + $0x1], 0  ;;  %s948_s15 = smov 0   ;;  %s950_s16 = smov 0  }
   0x9   :  { %s952_s17 = smov 0   ;;  %s954_s18 = smov 0  }
   0xa   :  { %s956_s19 = smov 0   ;;  %s958_s20 = smov 0  }
   0xb LB: > { %1136 = sst [smem:[#allocation14_spill]] %s900_s17  ;;  %s979_s21 = sadd.s32 4294967295, %s912_s20   ;;  %s912_s20 = sphi %s958_s20, %s23_s20   ;;  %s908_s19 = sphi %s956_s19, %s1154_s19   ;;  %s904_s18 = sphi %s954_s18, %s1150_s18   ;;  %s900_s17 = sphi %s952_s17, %s1149_s17   ;;  %s896_s16 = sphi %s950_s16, %s1153_s16   ;;  %s892_s15 = sphi %s948_s15, %s1152_s15  }
   0xc   : > { %1137 = sst [smem:[#allocation15_spill]] %s908_s19  ;;  %s608_s22 = sadd.s32 4294967294, %s912_s20  }
   0xd   : > { %p57_p0 = scmp.ne.s32.totalorder %s896_s16, %s892_s15  ;;  %p58_p1 = scmp.eq.s32.totalorder %s979_s21, 0 }
   0xe   : > { %p151_p2 = scmp.eq.s32.totalorder %s979_s21, 1  ;;  %p157_p3 = scmp.eq.s32.totalorder %s608_s22, 1 }
   0xf   : > { %p988_p4 = por %p58_p1, %p57_p0  ;;  %p609_p5 = scmp.ge.s32.totalorder %s912_s20, 1 }
  0x10   : > { %p993_p6 = por %p157_p3, %p57_p0  ;;  %p164_p7 = scmp.lt.s32.totalorder %s912_s20, 3 }
  0x11   : > { %s1140_s2 = sld [smem:[#allocation19_spill]]  ;;  %s914_s29 = smov [#allocation8]  }
  0x12   : > { %p1001_p8 = pnand %p609_p5, %p164_p7  ;;  %s177_s30 = sshll.u32 %s914_s29, 4  ;;  %s178_s30 = int_to_ptr.vmem [resolvable:$true] %s177_s30 }
  0x13   : > { %p611_p11 = scmp.ge.s32.totalorder %s912_s20, 2  ;;  %s915_s5 = smov 256  }
  0x14   : > { %p656_p9 = pneg %p1001_p8  ;;  %s916_s6 = smov 16  }
  0x15   : > { %s35_s7 = sadd.s32 1, %s908_s19  ;;  %s44_s8 = sadd.s32 1, %s900_s17 }
  0x16   : > { %p657_p10 = pnand %p656_p9, %p58_p1  ;;  %p37_p12 = scmp.ge.s32.totalorder %s35_s7, 2 }
  0x17   : > { %s175_s27 = sshll.u32 %s1140_s2, 4  ;;  %p51_p13 = scmp.ne.s32.totalorder %s900_s17, %s896_s16  ;;  %s176_s27 = int_to_ptr.hbm [resolvable:$true] %s175_s27 }
  0x18   : > { %659 = dma.hbm_to_vmem [thread:$0]  (!%p657_p10), %s176_s27, 4096, %s178_s30, [#allocation7], %s915_s5, %s915_s5, %s916_s6  }
  0x19   : > { %p52_p0 = scmp.eq.s32.totalorder %s912_s20, 0  ;;  %s1156_s7 = smov (%p37_p12, %s35_s7), 0 }
  0x1a   : > { %1142 = sst [smem:[#allocation16_spill]] %s1156_s7  ;;  %p1023_p5 = por %p151_p2, %p51_p13 }
  0x1b   : > { %p1017_p3 = por %p52_p0, %p51_p13  ;;  %s39_s11 = ssub.s32 %s908_s19, %s1156_s7 }
  0x1c   : > { %p672_p7 = scmp.lt.s32.totalorder %s912_s20, 2  ;;  %p42_p9 = scmp.eq.s32.totalorder %s39_s11, 0 }
  0x1d   : > { %s194_s12 = sand.u32 1, %s900_s17   ;;  %s634_s22 = sshll.u32 %s908_s19, 4 }
  0x1e   : > { %s612_s13 = sshll.u32 %s194_s12, 4  ;;  %s1146_s0 = sld [smem:[#allocation18_spill]] }
  0x1f   : > { %s1032_s14 = scalar_select %p42_p9, %s900_s17, %s44_s8  }
  0x20   : > { %s198_s29 = scalar_lea.vmem [#allocation3], %s612_s13  ;;  %p1040_p2 = pnand %p672_p7, %p1017_p3 }
  0x21   : > { %1145 = sst [smem:[#allocation17_spill]] %s1032_s14  ;;  %s208_s30 = sshll.u32 %s198_s29, 4  ;;  %s209_s30 = int_to_ptr.vmem [resolvable:$true] %s208_s30 }
  0x22   : > { %s195_s8 = scalar_lea.sflag [#allocation4], %s194_s12  ;;  %s917_s11 = smov 64  }
  0x23   : > { %s918_s2 = smov 4   ;;  %s222_s29 = scalar_lea.vmem [#allocation6], %s612_s13 }
  0x24   : > { %s205_s27 = scalar_lea.hbm %s1146_s0, %s634_s22  ;;  %s227_s0 = scalar_lea.hbm %s1127_s1, %s634_s22 }
  0x25   : > { %s206_s5 = sshll.u32 %s205_s27, 4  ;;  %s230_s27 = sshll.u32 %s222_s29, 4  ;;  %s207_s5 = int_to_ptr.hbm [resolvable:$true] %s206_s5  ;;  %s231_s27 = int_to_ptr.vmem [resolvable:$true] %s230_s27 }
  0x26   : > { %663 = dma.hbm_to_vmem [thread:$0]  (!%p1040_p2), %s207_s5, 256, %s209_s30, %s195_s8, %s917_s11, %s917_s11, %s918_s2  }
  0x27   : > { %s228_s7 = sshll.u32 %s227_s0, 4  ;;  %s218_s9 = sand.u32 1, %s912_s20   ;;  %s229_s7 = int_to_ptr.hbm [resolvable:$true] %s228_s7 }
  0x28   : > { %s219_s19 = scalar_lea.sflag [#allocation7], %s218_s9  ;;  %s919_s14 = smov 128  }
  0x29   : > { %s920_s17 = smov 8   ;;  %242 = sbr.rel (%p1001_p8) target bundleno = 371 (0x173), region = 36 }
  0x2a   : > { %666 = dma.hbm_to_vmem [thread:$0]  (!%p1040_p2), %s229_s7, 256, %s231_s27, %s219_s19, %s919_s14, %s919_s14, %s920_s17  }
  0x2b   : > { %s1055_s2 = sand.u32 (!%p1001_p8), 1, %s896_s16  }
  0x2c   : > { %s1058_s12 = sshll.u32 (!%p1001_p8), %s1055_s2, 4  ;;  %s245_s0 = scalar_lea.sflag (!%p1001_p8), [#allocation4], %s1055_s2 }
  0x2d   : > { %s248_s13 = scalar_lea.vmem (!%p1001_p8), [#allocation3], %s1058_s12 }
  0x2e   : > { %875 = dma.done.wait (%p988_p4), %s245_s0, 256  }
  0x2f   : > { %877 = vsyncadd (%p988_p4), %s245_s0, 4294967040  ;;  %s254_s17 = sand.u32 1, %s979_s21   ;;  %s258_s28 = scalar_lea.vmem [#allocation6], %s1058_s12 }
  0x30   : > { %s255_s19 = scalar_lea.sflag [#allocation7], %s254_s17 }
  0x31   : > { %879 = dma.done.wait (%p988_p4), %s255_s19, 256  }
  0x32   : > { %881 = vsyncadd (%p988_p4), %s255_s19, 4294967040 }
  0x33   : > { %883 = dma.done.wait (%p58_p1), [#allocation7], 4096  }
  0x34   : > { %885 = vsyncadd (%p58_p1), [#allocation7], 4294963200  ;;  %v332_v0 = vld [vmem:[#allocation8 + $0xf0] sm:$0xff]  ;;  %v333_v1 = vld [vmem:[#allocation8 + $0xf8] sm:$0xff]  ;;  %vm396_vm0 = vcmask 130048   ;;  %s636_s7 = sshll.u32 %s904_s18, 4 }
  0x35   : > { %v330_v2 = vld [vmem:[#allocation8 + $0xe0] sm:$0xff]  ;;  %340 = vmatpush.msra.mxu0 %v332_v0  ;;  %363 = vmatpush.msra.mxu1 %v333_v1  ;;  %v331_v3 = vld [vmem:[#allocation8 + $0xe8] sm:$0xff]  ;;  %v328_v4 = vld [vmem:[#allocation8 + $0xd0] sm:$0xff]  ;;  %s484_s30 = scalar_lea.hbm %s1130_s4, %s636_s7  ;;  %s293_s5 = scalar_lea.vmem [#allocation9], %s1058_s12 }
  0x36   : > { %v329_v5 = vld [vmem:[#allocation8 + $0xd8] sm:$0xff]  ;;  %v326_v6 = vld [vmem:[#allocation8 + $0xc0] sm:$0xff]  ;;  %v327_v7 = vld [vmem:[#allocation8 + $0xc8] sm:$0xff]  ;;  %s485_s6 = sshll.u32 %s293_s5, 4  ;;  %s487_s8 = sshll.u32 %s484_s30, 4  ;;  %s486_s6 = int_to_ptr.vmem [resolvable:$true] %s485_s6  ;;  %s488_s8 = int_to_ptr.hbm [resolvable:$true] %s487_s8 }
  0x37   : > { %341 = vmatpush.msra.mxu0 %v330_v2  ;;  %364 = vmatpush.msra.mxu1 %v331_v3  ;;  %v324_v8 = vld [vmem:[#allocation8 + $0xb0] sm:$0xff]  ;;  %v325_v9 = vld [vmem:[#allocation8 + $0xb8] sm:$0xff]  ;;  %v322_v10 = vld [vmem:[#allocation8 + $0xa0] sm:$0xff]  ;;  %s471_s11 = scalar_lea.sflag [#allocation5], %s1055_s2  ;;  %s836_s18 = sshra.s32 %s488_s8, 4  ;;  %s837_s18 = int_to_ptr.hbm [resolvable:$true] %s836_s18 }
  0x38   : > { %v323_v11 = vld [vmem:[#allocation8 + $0xa8] sm:$0xff]  ;;  %v320_v12 = vld [vmem:[#allocation8 + $0x90] sm:$0xff]  ;;  %v321_v13 = vld [vmem:[#allocation8 + $0x98] sm:$0xff]  ;;  %s838_s25 = scalar_lea.hbm %s837_s18, 16  ;;  %s842_s27 = scalar_lea.hbm %s1130_s4, 32 }
  0x39   : > { %342 = vmatpush.msra.mxu0 %v328_v4  ;;  %365 = vmatpush.msra.mxu1 %v329_v5  ;;  %v318_v14 = vld [vmem:[#allocation8 + $0x80] sm:$0xff]  ;;  %v319_v15 = vld [vmem:[#allocation8 + $0x88] sm:$0xff]  ;;  %v316_v16 = vld [vmem:[#allocation8 + $0x70] sm:$0xff]  ;;  %p839_p1 = scmp.ne.s32.totalorder %s837_s18, %s838_s25  ;;  %p843_p10 = scmp.lt.s32.totalorder %s837_s18, %s1130_s4 }
  0x3a   : > { %v317_v17 = vld [vmem:[#allocation8 + $0x78] sm:$0xff]  ;;  %v314_v18 = vld [vmem:[#allocation8 + $0x60] sm:$0xff]  ;;  %v315_v19 = vld [vmem:[#allocation8 + $0x68] sm:$0xff]  ;;  %p844_p12 = scmp.lt.s32.totalorder %s842_s27, %s838_s25 }
  0x3b   : > { %343 = vmatpush.msra.mxu0 %v326_v6  ;;  %366 = vmatpush.msra.mxu1 %v327_v7  ;;  %v312_v20 = vld [vmem:[#allocation8 + $0x50] sm:$0xff]  ;;  %v313_v21 = vld [vmem:[#allocation8 + $0x58] sm:$0xff]  ;;  %v310_v22 = vld [vmem:[#allocation8 + $0x40] sm:$0xff]  ;;  %p840_p4 = pnand %p839_p1, %p1023_p5 }
  0x3c   : > { %v311_v23 = vld [vmem:[#allocation8 + $0x48] sm:$0xff]  ;;  %v308_v24 = vld [vmem:[#allocation8 + $0x30] sm:$0xff]  ;;  %v309_v25 = vld [vmem:[#allocation8 + $0x38] sm:$0xff]  ;;  %p845_p13 = por %p844_p12, %p843_p10 }
  0x3d   : > { %344 = vmatpush.msra.mxu0 %v324_v8  ;;  %367 = vmatpush.msra.mxu1 %v325_v9  ;;  %v306_v26 = vld [vmem:[#allocation8 + $0x20] sm:$0xff]  ;;  %v307_v27 = vld [vmem:[#allocation8 + $0x28] sm:$0xff]  ;;  %v304_v28 = vld [vmem:[#allocation8 + $0x10] sm:$0xff]  ;;  %p841_p8 = pneg %p840_p4 }
  0x3e   : > { %v305_v29 = vld [vmem:[#allocation8 + $0x18] sm:$0xff]  ;;  %v302_v30 = vld [vmem:[#allocation8] sm:$0xff]  ;;  %v303_v31 = vld [vmem:[#allocation8 + $0x8] sm:$0xff] }
  0x3f   : > { %345 = vmatpush.msra.mxu0 %v322_v10  ;;  %368 = vmatpush.msra.mxu1 %v323_v11  ;;  %v300_v32 = vld [vmem:[%s258_s28] sm:$0xff]  ;;  %v301_v33 = vld [vmem:[%s258_s28 + $0x8] sm:$0xff]  ;;  %p846_p0 = pnand %p845_p13, %p841_p8 }
  0x40   : > { %v334_v36 = vld [vmem:[%s1129_s3] sm:$0x3]  ;;  %v645_v40 = vld [vmem:[%s248_s13 + $0x8] sm:$0xff]  }
  0x41   : > { %346 = vmatpush.msra.mxu0 %v320_v12  ;;  %369 = vmatpush.msra.mxu1 %v321_v13  ;;  %v336_v37 = vperm.slane %v334_v36, 0  ;;  %v337_v38 = vperm.slane %v334_v36, 1  ;;  %v638_v39 = vld [vmem:[%s248_s13] sm:$0xff]   ;;  %v643_v46 = vunpack.c.l.bf16 %v645_v40  ;;  %v644_v50 = vunpack.c.h.bf16 %v645_v40 }
  0x42   : > { %v639_v45 = vunpack.c.l.bf16 %v638_v39  ;;  %v640_v49 = vunpack.c.h.bf16 %v638_v39 }
  0x43   : > { %347 = vmatpush.msra.mxu0 %v318_v14  ;;  %370 = vmatpush.msra.mxu1 %v319_v15 }
  0x45   : > { %348 = vmatpush.msra.mxu0 %v316_v16  ;;  %371 = vmatpush.msra.mxu1 %v317_v17 }
  0x47   : > { %349 = vmatpush.msra.mxu0 %v314_v18  ;;  %372 = vmatpush.msra.mxu1 %v315_v19 }
  0x49   : > { %350 = vmatpush.msra.mxu0 %v312_v20  ;;  %373 = vmatpush.msra.mxu1 %v313_v21 }
  0x4b   : > { %351 = vmatpush.msra.mxu0 %v310_v22  ;;  %374 = vmatpush.msra.mxu1 %v311_v23 }
  0x4d   : > { %352 = vmatpush.msra.mxu0 %v308_v24  ;;  %375 = vmatpush.msra.mxu1 %v309_v25 }
  0x4f   : > { %353 = vmatpush.msra.mxu0 %v306_v26  ;;  %376 = vmatpush.msra.mxu1 %v307_v27 }
  0x51   : > { %354 = vmatpush.msra.mxu0 %v304_v28  ;;  %377 = vmatpush.msra.mxu1 %v305_v29 }
  0x53   : > { %355 = vmatpush.msra.mxu0 %v302_v30  ;;  %378 = vmatpush.msra.mxu1 %v303_v31 }
  0x54   : > { %356 = vmatmul.f32.vlgmr.msra.gmra.mxu0 %v300_v32  ;;  %379 = vmatmul.f32.vlgmr.msra.gmra.mxu1 %v300_v32 }
  0x5c   : > { %359 = vmatmul.f32.gmra.mxu0 %v301_v33  ;;  %382 = vmatmul.f32.gmra.mxu1 %v301_v33 }
  0xd1   : > { %v357_v34 = vpop.f32.mrf.mxu0  ;;  %v380_v35 = vpop.f32.mrf.mxu1 }
  0xd2   : > { %v358_v47 = vadd.f32 %v357_v34, %v336_v37  ;;  %v381_v48 = vadd.f32 %v380_v35, %v337_v38 }
  0xd9   : > { %v360_v41 = vpop.f32.mrf.mxu0  ;;  %v383_v42 = vpop.f32.mrf.mxu1 }
  0xda   : > { %v361_v43 = vadd.f32 %v360_v41, %v336_v37  ;;  %v384_v44 = vadd.f32 %v383_v42, %v337_v38 }
  0xdc   : > { %417 = vmatpush.msra.mxu2 %v361_v43  ;;  %455 = vmatpush.msra.mxu3 %v384_v44 }
  0xde   : > { %418 = vmatpush.msra.mxu2 %v358_v47  ;;  %456 = vmatpush.msra.mxu3 %v381_v48 }
  0xdf   : > { %623 = vmatmul.msk.f32.vlgmr.msra.gmra.mxu2 %vm396_vm0, %v639_v45  ;;  %627 = vmatmul.msk.f32.vlgmr.msra.gmra.mxu3 %vm396_vm0, %v643_v46 }
  0xe7   : > { %624 = vmatmul.msk.f32.gmra.mxu2 %vm396_vm0, %v640_v49  ;;  %628 = vmatmul.msk.f32.gmra.mxu3 %vm396_vm0, %v644_v50 }
 0x162   : > { %v420_v51 = vpop.f32.mrf.mxu2  ;;  %v458_v52 = vpop.f32.mrf.mxu3 }
 0x163   : > { %v426_v53 = vmax.f32 %v420_v51, 0.0  ;;  %v464_v54 = vmax.f32 %v458_v52, 0.0 }
 0x165   : > { %v466_v55 = vadd.f32 %v464_v54, %v426_v53 }
 0x167   : > { %468 = vst [vmem:[%s293_s5] sm:$0xff] %v466_v55 }
 0x16a   : > { %v423_v56 = vpop.f32.mrf.mxu2  ;;  %v461_v57 = vpop.f32.mrf.mxu3 }
 0x16b   : > { %v427_v58 = vmax.f32 %v423_v56, 0.0  ;;  %v465_v59 = vmax.f32 %v461_v57, 0.0 }
 0x16d   : > { %v467_v60 = vadd.f32 %v465_v59, %v427_v58 }
 0x16f   : > { %469 = vst [vmem:[%s293_s5 + $0x8] sm:$0xff] %v467_v60 }
 0x170   : > { %849 = shalt.err (!%p846_p0)
}
 0x171   : > { %s921_s2 = smov 128   ;;  %s922_s0 = smov 8  }
 0x172   : > { %654 = dma.vmem_to_hbm [thread:$0]  (%p1023_p5), %s486_s6, 256, %s488_s8, %s471_s11, %s921_s2, %s921_s2, %s922_s0  }
 0x173 PF: > { %s502_s13 = sand.u32 1, %s892_s15   ;;  %p668_p3 = pnand %p611_p11, %p993_p6 }
 0x174   : > { %s503_s17 = scalar_lea.sflag [#allocation5], %s502_s13 }
 0x175   : > { %p669_p7 = pneg %p668_p3 }
 0x177   : > { %887 = dma.done.wait (%p669_p7), %s503_s17, 256  }
 0x178   : > { %889 = vsyncadd (%p669_p7), %s503_s17, 4294967040  ;;  %s23_s20 = sadd.s32 1, %s912_s20   ;;  %s1148_s19 = sld [smem:[#allocation14_spill]] }
 0x179   : > { %p20_p9 = scmp.ge.s32.totalorder %s23_s20, 4   ;;  %s1149_s17 = sld [smem:[#allocation17_spill]] }
 0x17a   : > { %s1150_s18 = sld [smem:[#allocation15_spill]]  ;;  %s1152_s15 = smov %s896_s16 }
 0x17b   : > { %s1151_s10 = sld [smem:[#allocation16_spill]] }
 0x17d   :  { %22 = sbr.rel (!%p20_p9) target bundleno = 11 (0xb), region = 103 }
 0x17e   : > { %s1153_s16 = smov %s1148_s19 }
 0x181   : > { %s1154_s19 = smov %s1151_s10 }
 0x182   :  { %509 = vsyncpa [#allocation4], 1 }
 0x183   :  { %511 = vsyncpa [#allocation4 + $0x1], 1 }
 0x184   :  { %512 = vsyncpa [#allocation7], 1 }
 0x185   :  { %514 = vsyncpa [#allocation7 + $0x1], 1 }
 0x186   :  { %515 = vsyncpa [#allocation5], 1 }
 0x187   :  { %517 = vsyncpa [#allocation5 + $0x1], 1 }

</bundles_post_ra>
